<compile_context>
chip_gen: v7x
topology: tpu7x:2x2x1
jax: 0.10.0
libtpu: 0.0.40
codegen_flags: <defaults>
</compile_context>

<pallas_src>
import functools

import jax
import jax.numpy as jnp
from jax.experimental import pallas as pl
from jax.experimental.pallas import tpu as pltpu


_LANE = 128
_MIB = 1024 * 1024
_VMEM_HEADROOM = 4 * _MIB
_VMEM_FLOOR = 32 * _MIB


def _round_up(x, m):
    return ((x + m - 1) // m) * m


def _ceil_div(a, b):
    return -(-a // b)


def _sublane_pack(itemsize):
    # Rows per (sublane-packed) tile: 8 for f32, 16 for bf16, 32 for int8.
    return max(8, 32 // max(1, itemsize))


def _padded_tile_bytes(rows, cols, itemsize):
    # VMEM footprint of a small 2-D tile after sublane/lane tile padding.
    return _round_up(rows, _sublane_pack(itemsize)) * _round_up(cols, _LANE) * itemsize


def _tpu_vmem_capacity_bytes():
    # Generation-aware physical VMEM (128 MiB on v5e/v6e, 64 MiB on v7x).
    try:
        info = pltpu.get_tpu_info()
        cap = int(getattr(info, "vmem_capacity_bytes", 0) or 0)
        if cap > 0:
            return cap
    except Exception:
        pass
    return 64 * _MIB  # conservative default (v7x)


def _largest_divisor_leq(n, cap):
    # Largest divisor of n that is <= cap (bounded search; 1 always valid).
    cap = int(max(1, min(n, cap)))
    for d in range(cap, max(0, cap - 4096), -1):
        if n % d == 0:
            return d
    return 1


# --------------------------- fused single-pass kernel ---------------------------
def _cse_fused_kernel(x_ref, w1_ref, b1_ref, w2_ref, b2_ref, o_ref, *, inv_hw):
    # x_ref / o_ref: (Bn, C, HW); weights are small and held resident.
    # Squeeze: spatial mean with f32 accumulation (first read of the block).
    z = jnp.sum(x_ref[...], axis=2, dtype=jnp.float32) * inv_hw          # (Bn, C)
    # Excitation MLP: Linear -> ReLU -> Linear -> Sigmoid, all in f32.
    h = jnp.dot(z, w1_ref[...].astype(jnp.float32),
                preferred_element_type=jnp.float32) + b1_ref[...].astype(jnp.float32)
    h = jnp.maximum(h, 0.0)                                              # (Bn, Ch)
    logits = jnp.dot(h, w2_ref[...].astype(jnp.float32),
                     preferred_element_type=jnp.float32) + b2_ref[...].astype(jnp.float32)
    e = jax.nn.sigmoid(logits)                                           # (Bn, C) f32
    # Rescale: second, independent read of the block; multiply in the I/O dtype
    # (no full-slab f32 materialization; bf16 stays bf16 on the store path).
    o_ref[...] = x_ref[...] * e.astype(o_ref.dtype)[:, :, None]


# --------------------------- two-pass fallback kernels ---------------------------
def _spatial_sum_kernel(x_ref, z_ref, *, hw, hw_tile, needs_mask):
    # grid = (N, n_hw_tiles); HW-tile axis is last ("arbitrary"), output block
    # index is constant along it -> z_ref stays resident and accumulates (f32).
    @pl.when(pl.program_id(1) == 0)
    def _():
        z_ref[...] = jnp.zeros_like(z_ref)
    x = x_ref[...].astype(jnp.float32)                                   # (1, C, hw_tile)
    if needs_mask:
        # Ragged last tile: zero the lanes past the true H*W before reducing
        # (OOB lanes of the edge block contain unspecified data).
        lane = jax.lax.broadcasted_iota(jnp.int32, x.shape, 2)
        lane = lane + pl.program_id(1) * hw_tile
        x = jnp.where(lane < hw, x, 0.0)
    z_ref[...] += jnp.sum(x, axis=2, keepdims=True)


def _rescale_kernel(x_ref, e_ref, o_ref):
    # x_ref/o_ref: (1, C, hw_tile), e_ref: (1, C, 1). Multiply in the I/O dtype;
    # OOB lanes of a ragged last tile are dropped by Pallas on writeback.
    o_ref[...] = x_ref[...] * e_ref[...].astype(o_ref.dtype)


def cse_forward(x, w1, b1, w2, b2, *, vmem_budget_bytes=None):
    """CSE forward. x: (N, C, H, W). Weights stored pre-transposed vs torch:
       w1: (C, C//16), b1: (1, C//16), w2: (C//16, C), b2: (1, C)."""
    N, C, H, W = x.shape
    Ch = w1.shape[1]
    HW = H * W
    inv_hw = 1.0 / HW
    itemsize = jnp.dtype(x.dtype).itemsize

    physical = _tpu_vmem_capacity_bytes()
    scoped_cap = max(_VMEM_FLOOR, physical - 8 * _MIB)        # never above physical VMEM
    if vmem_budget_bytes is None:
        # ~96 MiB on v5e/v6e (128 MiB physical), ~48 MiB on v7x (64 MiB physical).
        vmem_budget_bytes = (physical * 3) // 4
    vmem_budget_bytes = int(min(vmem_budget_bytes, scoped_cap))

    # No HBM padding: blocks use the full flattened spatial extent directly.
    x3 = x.reshape(N, C, HW)

    # Per-batch-element VMEM residency on the fused path: double-buffered input
    # + output blocks, plus one f32 temporary for the reduction upcast (bf16 only).
    Cp = _round_up(C, _sublane_pack(itemsize))
    HWl = _round_up(HW, _LANE)
    f32_temp = Cp * HWl * 4 if itemsize < 4 else 0
    fused_bytes_per_n = 4 * Cp * HWl * itemsize + f32_temp
    w_itemsize = jnp.dtype(w1.dtype).itemsize
    weights_resident = 2 * (_padded_tile_bytes(C, Ch, w_itemsize)
                            + _padded_tile_bytes(1, Ch, w_itemsize)
                            + _padded_tile_bytes(Ch, C, w_itemsize)
                            + _padded_tile_bytes(1, C, w_itemsize))

    if fused_bytes_per_n + weights_resident <= vmem_budget_bytes:
        # ---------------- fused path: Bn batch elements per grid step ----------------
        bn_fit = (vmem_budget_bytes - weights_resident) // fused_bytes_per_n
        # Keep >= ~4 grid steps so DMA double-buffering overlaps compute and the
        # batch-chunk axis can shard across both v7x TensorCores. Bn divides N,
        # so no batch padding (and no extra HBM traffic) is needed.
        bn_target = max(1, _ceil_div(N, 4))
        Bn = _largest_divisor_leq(N, min(bn_fit, bn_target))
        grid_n = N // Bn

        resident = Bn * fused_bytes_per_n + weights_resident
        vmem_limit = int(min(scoped_cap, max(resident + _VMEM_HEADROOM, _VMEM_FLOOR)))

        out3 = pl.pallas_call(
            functools.partial(_cse_fused_kernel, inv_hw=inv_hw),
            out_shape=jax.ShapeDtypeStruct((N, C, HW), x.dtype),
            grid_spec=pltpu.PrefetchScalarGridSpec(
                num_scalar_prefetch=0,
                grid=(grid_n,),
                in_specs=[
                    pl.BlockSpec((Bn, C, HW), lambda n: (n, 0, 0)),
                    pl.BlockSpec((C, Ch), lambda n: (0, 0)),
                    pl.BlockSpec((1, Ch), lambda n: (0, 0)),
                    pl.BlockSpec((Ch, C), lambda n: (0, 0)),
                    pl.BlockSpec((1, C), lambda n: (0, 0)),
                ],
                out_specs=pl.BlockSpec((Bn, C, HW), lambda n: (n, 0, 0)),
            ),
            compiler_params=pltpu.CompilerParams(
                dimension_semantics=("parallel",),
                vmem_limit_bytes=vmem_limit),
        )(x3, w1, b1, w2, b2)

        return out3.reshape(N, C, H, W)

    # -------- two-pass fallback: per-element slab exceeds the VMEM budget --------
    # Reads x twice (<=1.5x HBM traffic) but keeps deep pipelining with HW tiles.
    def pick_tile(bytes_per_lane_col):
        t = (vmem_budget_bytes // max(1, bytes_per_lane_col)) // _LANE * _LANE
        t = max(_LANE, t)
        if t >= HW:
            return HW, 1                    # single full-extent tile (exempt from /128)
        return t, _ceil_div(HW, t)

    # Pass 1 keeps only 2 input buffers (+ f32 upcast temp) resident -> bigger tiles.
    hw_tile1, n_t1 = pick_tile(Cp * (2 * itemsize + 4))
    # Pass 2 has double-buffered input + output blocks in the I/O dtype.
    hw_tile2, n_t2 = pick_tile(Cp * 4 * itemsize)

    def pass_vmem_limit(resident_bytes):
        return int(min(scoped_cap, max(resident_bytes + _VMEM_HEADROOM, _VMEM_FLOOR)))

    small = 4 * _padded_tile_bytes(C, 1, 4)
    p1_resident = Cp * _round_up(hw_tile1, _LANE) * (2 * itemsize + 4) + small
    p2_resident = Cp * _round_up(hw_tile2, _LANE) * 4 * itemsize + small

    # Pass 1: spatial sum, channels kept on the sublane axis as (N, C, 1) f32.
    z3 = pl.pallas_call(
        functools.partial(_spatial_sum_kernel, hw=HW, hw_tile=hw_tile1,
                          needs_mask=(HW % hw_tile1) != 0),
        out_shape=jax.ShapeDtypeStruct((N, C, 1), jnp.float32),
        grid_spec=pltpu.PrefetchScalarGridSpec(
            num_scalar_prefetch=0,
            grid=(N, n_t1),
            in_specs=[pl.BlockSpec((1, C, hw_tile1), lambda n, t: (n, 0, t))],
            out_specs=pl.BlockSpec((1, C, 1), lambda n, t: (n, 0, 0)),
        ),
        compiler_params=pltpu.CompilerParams(
            dimension_semantics=("parallel", "arbitrary"),
            vmem_limit_bytes=pass_vmem_limit(p1_resident)),
    )(x3)

    # Tiny excitation MLP between passes runs as plain XLA (negligible cost).
    z = z3[:, :, 0] * inv_hw                                   # (N, C) f32
    h = jnp.maximum(z @ w1.astype(jnp.float32) + b1.astype(jnp.float32), 0.0)
    e = jax.nn.sigmoid(h @ w2.astype(jnp.float32) + b2.astype(jnp.float32))
    e3 = e[:, :, None].astype(jnp.float32)                     # (N, C, 1)

    # Pass 2: broadcasted rescale; both grid axes independent -> both v7x TCs busy.
    out3 = pl.pallas_call(
        _rescale_kernel,
        out_shape=jax.ShapeDtypeStruct((N, C, HW), x.dtype),
        grid_spec=pltpu.PrefetchScalarGridSpec(
            num_scalar_prefetch=0,
            grid=(N, n_t2),
            in_specs=[
                pl.BlockSpec((1, C, hw_tile2), lambda n, t: (n, 0, t)),
                pl.BlockSpec((1, C, 1), lambda n, t: (n, 0, 0)),
            ],
            out_specs=pl.BlockSpec((1, C, hw_tile2), lambda n, t: (n, 0, t)),
        ),
        compiler_params=pltpu.CompilerParams(
            dimension_semantics=("parallel", "parallel"),
            vmem_limit_bytes=pass_vmem_limit(p2_resident)),
    )(x3, e3)

    return out3.reshape(N, C, H, W)


def cse_reference(x, w1, b1, w2, b2):
    x = x.astype(jnp.float32)
    z = x.mean(axis=3).mean(axis=2)                            # (N, C)
    h = jnp.maximum(z @ w1.astype(jnp.float32) + b1.astype(jnp.float32), 0.0)
    e = jax.nn.sigmoid(h @ w2.astype(jnp.float32) + b2.astype(jnp.float32))
    return x * e[:, :, None, None]


if __name__ == "__main__":
    key = jax.random.PRNGKey(0)
    kx, k1, k2, k3, k4, kx2, kx3 = jax.random.split(key, 7)

    # ---- case 1: f32, lane-aligned spatial -> fused path with pipelined steps ----
    N, C, H, W = 2, 64, 16, 16
    Ch = C // 16
    x = jax.random.normal(kx, (N, C, H, W), dtype=jnp.float32)
    w1 = jax.random.normal(k1, (C, Ch), dtype=jnp.float32) * 0.1
    b1 = jax.random.normal(k2, (1, Ch), dtype=jnp.float32) * 0.1
    w2 = jax.random.normal(k3, (Ch, C), dtype=jnp.float32) * 0.1
    b2 = jax.random.normal(k4, (1, C), dtype=jnp.float32) * 0.1

    out = jax.block_until_ready(cse_forward(x, w1, b1, w2, b2))
    ref = cse_reference(x, w1, b1, w2, b2)
    assert out.shape == (N, C, H, W)
    assert jnp.allclose(out, ref, atol=1e-5, rtol=1e-5), "fused f32 mismatch"

    # ---- case 2: bf16 I/O + non-128 spatial (full-HW block, masked edge vst) ----
    N2, C2, H2, W2 = 3, 32, 14, 14
    Ch2 = C2 // 16
    xb = jax.random.normal(kx2, (N2, C2, H2, W2), dtype=jnp.float32).astype(jnp.bfloat16)
    w1b = jax.random.normal(k1, (C2, Ch2), dtype=jnp.float32) * 0.1
    b1b = jax.random.normal(k2, (1, Ch2), dtype=jnp.float32) * 0.1
    w2b = jax.random.normal(k3, (Ch2, C2), dtype=jnp.float32) * 0.1
    b2b = jax.random.normal(k4, (1, C2), dtype=jnp.float32) * 0.1

    outb = jax.block_until_ready(cse_forward(xb, w1b, b1b, w2b, b2b))
    refb = cse_reference(xb, w1b, b1b, w2b, b2b)
    assert outb.dtype == jnp.bfloat16 and outb.shape == (N2, C2, H2, W2)
    assert jnp.allclose(outb.astype(jnp.float32), refb, atol=5e-2, rtol=5e-2), \
        "bf16 mismatch"

    # ---- case 3: force the two-pass fallback (lane-aligned tiles) ----
    out2 = jax.block_until_ready(
        cse_forward(x, w1, b1, w2, b2, vmem_budget_bytes=128 * 1024))
    assert jnp.allclose(out2, ref, atol=1e-5, rtol=1e-5), "two-pass mismatch"

    # ---- case 4: two-pass fallback with ragged HW tiles (in-kernel masking) ----
    N3, C3, H3, W3 = 2, 64, 10, 13   # HW = 130, not a multiple of 128
    xr = jax.random.normal(kx3, (N3, C3, H3, W3), dtype=jnp.float32)
    outr = jax.block_until_ready(
        cse_forward(xr, w1, b1, w2, b2, vmem_budget_bytes=96 * 1024))
    refr = cse_reference(xr, w1, b1, w2, b2)
    assert jnp.allclose(outr, refr, atol=1e-5, rtol=1e-5), "ragged two-pass mismatch"

    print("KERNEL_OK")
</pallas_src>

<mosaic_0001>
module attributes {stable_mosaic.version = 11 : i64} {
  func.func @_cse_fused_kernel(%arg0: i32, %arg1: memref<1x64x256xf32, #tpu.memory_space<vmem>>, %arg2: memref<64x4xf32, #tpu.memory_space<vmem>>, %arg3: memref<1x4xf32, #tpu.memory_space<vmem>>, %arg4: memref<4x64xf32, #tpu.memory_space<vmem>>, %arg5: memref<1x64xf32, #tpu.memory_space<vmem>>, %arg6: memref<1x64x256xf32, #tpu.memory_space<vmem>>) attributes {dimension_semantics = [#tpu.dimension_semantics<parallel>], iteration_bounds = array<i64: 2>, scalar_prefetch = 0 : i64, scratch_operands = 0 : i64, tpu.core_type = #tpu.core_type<tc>, window_params = [{transform_indices = @transform_0, window_bounds = array<i64: 1, 64, 256>}, {pipeline_mode = #tpu.pipeline_mode<synchronous>, transform_indices = @transform_1, window_bounds = array<i64: 64, 4>}, {pipeline_mode = #tpu.pipeline_mode<synchronous>, transform_indices = @transform_2, window_bounds = array<i64: 1, 4>}, {pipeline_mode = #tpu.pipeline_mode<synchronous>, transform_indices = @transform_3, window_bounds = array<i64: 4, 64>}, {pipeline_mode = #tpu.pipeline_mode<synchronous>, transform_indices = @transform_4, window_bounds = array<i64: 1, 64>}, {transform_indices = @transform_5, window_bounds = array<i64: 1, 64, 256>}]} {
    %c0 = arith.constant 0 : index
    %c0_0 = arith.constant 0 : index
    %c0_1 = arith.constant 0 : index
    %0 = vector.load %arg1[%c0, %c0_0, %c0_1] : memref<1x64x256xf32, #tpu.memory_space<vmem>>, vector<1x64x256xf32>
    %cst = arith.constant dense<0.000000e+00> : vector<1x64xf32>
    %1 = vector.multi_reduction <add>, %0, %cst [2] : vector<1x64x256xf32> to vector<1x64xf32>
    %cst_2 = arith.constant 3.906250e-03 : f32
    %2 = vector.broadcast %cst_2 : f32 to vector<1x64xf32>
    %3 = arith.mulf %1, %2 : vector<1x64xf32>
    %c0_3 = arith.constant 0 : index
    %c0_4 = arith.constant 0 : index
    %4 = vector.load %arg2[%c0_3, %c0_4] : memref<64x4xf32, #tpu.memory_space<vmem>>, vector<64x4xf32>
    %cst_5 = arith.constant dense<0.000000e+00> : vector<1x4xf32>
    %5 = tpu.matmul %3, %4, %cst_5 {dimension_numbers = #tpu.dot_dimension_numbers<[1], [0], [0], [1], [0, 0, 1, 1], [], []>} : vector<1x64xf32>, vector<64x4xf32>, vector<1x4xf32> -> vector<1x4xf32>
    %c0_6 = arith.constant 0 : index
    %c0_7 = arith.constant 0 : index
    %6 = vector.load %arg3[%c0_6, %c0_7] : memref<1x4xf32, #tpu.memory_space<vmem>>, vector<1x4xf32>
    %7 = arith.addf %5, %6 : vector<1x4xf32>
    %cst_8 = arith.constant 0.000000e+00 : f32
    %8 = vector.broadcast %cst_8 : f32 to vector<1x4xf32>
    %9 = arith.maximumf %7, %8 : vector<1x4xf32>
    %c0_9 = arith.constant 0 : index
    %c0_10 = arith.constant 0 : index
    %10 = vector.load %arg4[%c0_9, %c0_10] : memref<4x64xf32, #tpu.memory_space<vmem>>, vector<4x64xf32>
    %cst_11 = arith.constant dense<0.000000e+00> : vector<1x64xf32>
    %11 = tpu.matmul %9, %10, %cst_11 {dimension_numbers = #tpu.dot_dimension_numbers<[1], [0], [0], [1], [0, 0, 1, 1], [], []>} : vector<1x4xf32>, vector<4x64xf32>, vector<1x64xf32> -> vector<1x64xf32>
    %c0_12 = arith.constant 0 : index
    %c0_13 = arith.constant 0 : index
    %12 = vector.load %arg5[%c0_12, %c0_13] : memref<1x64xf32, #tpu.memory_space<vmem>>, vector<1x64xf32>
    %13 = arith.addf %11, %12 : vector<1x64xf32>
    %14 = arith.negf %13 : vector<1x64xf32>
    %15 = math.exp %14 : vector<1x64xf32>
    %cst_14 = arith.constant 1.000000e+00 : f32
    %16 = vector.broadcast %cst_14 : f32 to vector<1x64xf32>
    %17 = arith.addf %16, %15 : vector<1x64xf32>
    %18 = arith.divf %16, %17 : vector<1x64xf32>
    %c0_15 = arith.constant 0 : index
    %c0_16 = arith.constant 0 : index
    %c0_17 = arith.constant 0 : index
    %19 = vector.load %arg1[%c0_15, %c0_16, %c0_17] : memref<1x64x256xf32, #tpu.memory_space<vmem>>, vector<1x64x256xf32>
    %20 = vector.shape_cast %18 : vector<1x64xf32> to vector<1x64x1xf32>
    %21 = vector.broadcast %20 : vector<1x64x1xf32> to vector<1x64x256xf32>
    %22 = arith.mulf %19, %21 : vector<1x64x256xf32>
    %c0_18 = arith.constant 0 : index
    %c0_19 = arith.constant 0 : index
    %c0_20 = arith.constant 0 : index
    %23 = vector.load %arg6[%c0_18, %c0_19, %c0_20] : memref<1x64x256xf32, #tpu.memory_space<vmem>>, vector<1x64x256xf32>
    tpu.vector_store %arg6[%c0_18, %c0_19, %c0_20], %22 {strides = array<i32>} : memref<1x64x256xf32, #tpu.memory_space<vmem>>, vector<1x64x256xf32>,
    return
  }
  func.func @transform_0(%arg0: i32) -> (i32, i32, i32) {
    %c0_i32 = arith.constant 0 : i32
    %c0_i32_0 = arith.constant 0 : i32
    %c0_i32_1 = arith.constant 0 : i32
    return %arg0, %c0_i32, %c0_i32_0 : i32, i32, i32
  }
  func.func @transform_1(%arg0: i32) -> (i32, i32) {
    %c0_i32 = arith.constant 0 : i32
    %c0_i32_0 = arith.constant 0 : i32
    %c0_i32_1 = arith.constant 0 : i32
    return %c0_i32, %c0_i32_0 : i32, i32
  }
  func.func @transform_2(%arg0: i32) -> (i32, i32) {
    %c0_i32 = arith.constant 0 : i32
    %c0_i32_0 = arith.constant 0 : i32
    %c0_i32_1 = arith.constant 0 : i32
    return %c0_i32, %c0_i32_0 : i32, i32
  }
  func.func @transform_3(%arg0: i32) -> (i32, i32) {
    %c0_i32 = arith.constant 0 : i32
    %c0_i32_0 = arith.constant 0 : i32
    %c0_i32_1 = arith.constant 0 : i32
    return %c0_i32, %c0_i32_0 : i32, i32
  }
  func.func @transform_4(%arg0: i32) -> (i32, i32) {
    %c0_i32 = arith.constant 0 : i32
    %c0_i32_0 = arith.constant 0 : i32
    %c0_i32_1 = arith.constant 0 : i32
    return %c0_i32, %c0_i32_0 : i32, i32
  }
  func.func @transform_5(%arg0: i32) -> (i32, i32, i32) {
    %c0_i32 = arith.constant 0 : i32
    %c0_i32_0 = arith.constant 0 : i32
    %c0_i32_1 = arith.constant 0 : i32
    return %arg0, %c0_i32, %c0_i32_0 : i32, i32, i32
  }
}

</mosaic_0001>

<bundles_post_ra>
// kernel: tpu_custom_call.1
= control target key start
LH: loop header
LB: loop body
LE: loop exit
PB: predicated region body
PF: predicated region fallthrough
CT: control target
= control target key end

     0   :  { %10 = vsyncpa [#allocation3], 0  ;;  %s1232_s0 = inlined_call_operand.hbm [shape: f32[2,64,256], index: 0, kind: input, shape index: {}]   ;;  %s1233_s1 = inlined_call_operand.vmem [shape: f32[64,4], index: 1, kind: input, shape index: {}]   ;;  %s1234_s2 = inlined_call_operand.vmem [shape: f32[1,4], index: 2, kind: input, shape index: {}]   ;;  %s1235_s3 = inlined_call_operand.vmem [shape: f32[4,64], index: 3, kind: input, shape index: {}]   ;;  %s1236_s4 = inlined_call_operand.vmem [shape: f32[1,64], index: 4, kind: input, shape index: {}]   ;;  %s1237_s5 = inlined_call_operand.hbm [shape: f32[2,64,256], index: 5, kind: output, shape index: {}]  }
   0x1   :  { %12 = vsyncpa [#allocation3 + $0x1], 0 }
   0x2   :  { %13 = vsyncpa [#allocation4], 0 }
   0x3   :  { %15 = vsyncpa [#allocation4 + $0x1], 0  ;;  %s938_s18 = smov 0   ;;  %s940_s19 = smov 0  }
   0x4   :  { %s942_s20 = smov 0   ;;  %s944_s21 = smov 0  }
   0x5 LB: > { %s959_s22 = sadd.s32 4294967295, %s897_s21   ;;  %s677_s23 = sadd.s32 4294967294, %s897_s21   ;;  %s897_s21 = sphi %s944_s21, %s1250_s21   ;;  %s893_s20 = sphi %s942_s20, %s1249_s20   ;;  %s889_s19 = sphi %s940_s19, %s1248_s19   ;;  %s885_s18 = sphi %s938_s18, %s1247_s18  }
   0x6   : > { %s963_s24 = sadd.s32 1, %s897_s21   ;;  %s28_s25 = sadd.s32 1, %s893_s20 }
   0x7   : > { %s25_s26 = ssub.s32 %s897_s21, %s963_s24  ;;  %p35_p0 = scmp.ne.s32.totalorder %s893_s20, %s889_s19 }
   0x8   : > { %p26_p1 = scmp.eq.s32.totalorder %s25_s26, 0  ;;  %p36_p2 = scmp.eq.s32.totalorder %s897_s21, 0 }
   0x9   : > { %p41_p3 = scmp.ne.s32.totalorder %s889_s19, %s885_s18  ;;  %p42_p4 = scmp.eq.s32.totalorder %s959_s22, 0 }
   0xa   : > { %s975_s27 = scalar_select %p26_p1, %s893_s20, %s28_s25  }
   0xb   : > { %p977_p5 = por %p36_p2, %p35_p0  ;;  %p981_p6 = por %p42_p4, %p41_p3 }
   0xc   : > { %p149_p7 = scmp.eq.s32.totalorder %s959_s22, 1  ;;  %p155_p8 = scmp.eq.s32.totalorder %s677_s23, 1 }
   0xd   : > { %p756_p10 = scmp.lt.s32.totalorder %s897_s21, 2  ;;  %s187_s7 = sand.u32 1, %s893_s20  }
   0xe   : > { %p988_p11 = por %p149_p7, %p35_p0  ;;  %p992_p12 = por %p155_p8, %p41_p3 }
   0xf   : > { %s695_s8 = sshll.u32 %s897_s21, 11  ;;  %s680_s9 = sshll.u32 %s187_s7, 7 }
  0x10   : > { %s1241_s30 = scalar_select %p988_p11, 1, 0 }
  0x11   : > { %s1242_s6 = scalar_select %p992_p12, 1, 0 }
  0x12   : > { %s1001_s12 = scalar_lea.hbm %s1232_s0, %s695_s8  ;;  %s191_s13 = scalar_lea.vmem [#allocation2], %s680_s9 }
  0x13   : > { %s198_s14 = sshll.u32 %s191_s13, 4  ;;  %p1005_p13 = pnand %p756_p10, %p977_p5  ;;  %s1009_s14 = int_to_ptr.vmem [resolvable:$true] %s198_s14 }
  0x14   : > { %s1011_s16 = scalar_lea.sflag [#allocation3], %s187_s7  ;;  %s801_s17 = scalar_lea.hbm %s1001_s12, 2048 }
  0x15   : > { %p802_p0 = scmp.ne.s32.totalorder %s1001_s12, %s801_s17  ;;  %p803_p1 = pneg %p1005_p13 }
  0x16   : > { %s806_s26 = scalar_lea.hbm %s1232_s0, 4096  ;;  %p807_p4 = scmp.lt.u32.totalorder %s1001_s12, %s1232_s0 }
  0x17   : > { %p804_p2 = pnand %p803_p1, %p802_p0  ;;  %p808_p5 = scmp.lt.u32.totalorder %s806_s26, %s801_s17 }
  0x18   : > { %p810_p8 = scmp.lt.u32.totalorder %s801_s17, %s1001_s12 }
  0x19   : > { %p805_p3 = pneg %p804_p2  ;;  %p809_p7 = por %p808_p5, %p807_p4 }
  0x1b   : > { %p811_p10 = por %p810_p8, %p809_p7 }
  0x1d   : > { %p812_p9 = pnand %p811_p10, %p805_p3 }
  0x1f   : > { %815 = shalt.err (!%p812_p9)
}
  0x20   : > { %s816_s7 = scalar_lea.vmem %s1009_s14, 2048  ;;  %s899_s9 = smov [#allocation2]  }
  0x21   : > { %p817_p0 = scmp.ne.s32.totalorder %s1009_s14, %s816_s7  ;;  %s821_s10 = sshll.u32 %s899_s9, 4  ;;  %s822_s10 = int_to_ptr.vmem [resolvable:$false] %s821_s10 }
  0x22   : > { %s823_s11 = scalar_lea.vmem %s822_s10, 4096  ;;  %p824_p11 = scmp.lt.s32.totalorder %s1009_s14, %s822_s10 }
  0x23   : > { %p819_p2 = pnand %p817_p0, %p803_p1  ;;  %p825_p4 = scmp.lt.s32.totalorder %s823_s11, %s816_s7 }
  0x25   : > { %p820_p12 = pneg %p819_p2  ;;  %p826_p5 = por %p825_p4, %p824_p11 }
  0x27   : > { %p827_p7 = pnand %p826_p5, %p820_p12 }
  0x29   : > { %830 = shalt.err (!%p827_p7)
}
  0x2a   : > { %s900_s13 = smov 256   ;;  %s901_s17 = smov 16  }
  0x2b   : > { %751 = dma.hbm_to_vmem [thread:$0]  (!%p1005_p13), %s1001_s12, 2048, %s1009_s14, %s1011_s16, %s900_s13, %s900_s13, %s901_s17  }
  0x2c   : > { %p683_p9 = scmp.ge.s32.totalorder %s897_s21, 1  ;;  %p206_p1 = scmp.lt.s32.totalorder %s897_s21, 3 }
  0x2e   : > { %p207_p3 = pnand %p683_p9, %p206_p1 }
  0x2f   : > { %s1042_s23 = sand.u32 (!%p207_p3), 1, %s889_s19  }
  0x30   : > { %210 = sbr.rel (%p207_p3) target bundleno = 825 (0x339), region = 40  ;;  %s684_s25 = sshll.u32 (!%p207_p3), %s1042_s23, 7 }
  0x31   : > { %s213_s26 = scalar_lea.sflag (!%p207_p3), [#allocation3], %s1042_s23  ;;  %s216_s28 = scalar_lea.vmem (!%p207_p3), [#allocation2], %s684_s25 }
  0x37   : > { %876 = dma.done.wait (%p981_p6), %s213_s26, 2048  }
  0x38   : > { %878 = vsyncadd (%p981_p6), %s213_s26, 4294965248  ;;  %v1052_v0 = vld [vmem:[%s216_s28] sm:$0xff]  ;;  %v1054_v1 = vld [vmem:[%s216_s28 + $0x8] sm:$0xff]  ;;  %v902_v27 = vmov 0.0|0.0   ;;  %vm903_vm0 = vmmov 0   ;;  %v904_v37 = vmov 0.0   ;;  %v308_v38 = vlaneseq }
  0x39   : > { %v1056_v2 = vld [vmem:[%s216_s28 + $0x20] sm:$0xff]  ;;  %v259_v3 = vadd.f32 %v1054_v1, %v1052_v0  ;;  %v1060_v4 = vld [vmem:[%s216_s28 + $0x28] sm:$0xff]  ;;  %v1062_v5 = vld [vmem:[%s216_s28 + $0x10] sm:$0xff]  ;;  %732 = vmatprep.subr.bf16.mxu0 %v902_v27  ;;  %724 = vmatprep.mubr.msk.f32.mxu0 %vm903_vm0, %v904_v37  ;;  %vm319_vm1 = vcmask 130112   ;;  %vm326_vm2 = vcmask 195712   ;;  %vm333_vm3 = vcmask 261312  }
  0x3a   : > { %v1064_v6 = vld [vmem:[%s216_s28 + $0x18] sm:$0xff]  ;;  %v265_v7 = vadd.f32 %v1060_v4, %v1056_v2  ;;  %v1068_v8 = vld [vmem:[%s216_s28 + $0x30] sm:$0xff]  ;;  %v1076_v12 = vld [vmem:[%s216_s28 + $0x40] sm:$0xff]  ;;  %727 = vmatprep.subr.mxu1 %v904_v37  ;;  %729 = vmatprep.mubr.msk.f32.mxu1 %vm903_vm0, %v904_v37  ;;  %v309_v39 = vand.u32 127, %v308_v38  ;;  %v1124_v40 = vshrl.u32 %v308_v38, 7  ;;  %vm340_vm4 = vcmask 326912  }
  0x3b   : > { %v1070_v9 = vld [vmem:[%s216_s28 + $0x38] sm:$0xff]  ;;  %260 = vadd.xlane.f32.xlu0 %v259_v3  ;;  %v262_v10 = vadd.f32 %v1064_v6, %v1062_v5  ;;  %v1078_v13 = vld [vmem:[%s216_s28 + $0x48] sm:$0xff]  ;;  %v1080_v14 = vld [vmem:[%s216_s28 + $0x50] sm:$0xff]  ;;  %vm347_vm5 = vcmask 392512   ;;  %vm354_vm6 = vcmask 458112   ;;  %vm361_vm7 = vcmask 523712  }
  0x3c   : > { %266 = vadd.xlane.f32.xlu1 %v265_v7  ;;  %v268_v11 = vadd.f32 %v1070_v9, %v1068_v8  ;;  %v1082_v15 = vld [vmem:[%s216_s28 + $0x58] sm:$0xff]  ;;  %v271_v16 = vadd.f32 %v1078_v13, %v1076_v12  ;;  %v1088_v18 = vld [vmem:[%s216_s28 + $0x60] sm:$0xff]  ;;  %v1090_v19 = vld [vmem:[%s216_s28 + $0x68] sm:$0xff]  ;;  %v314_v41 = vadd.s32 4294967288, %v309_v39  ;;  %v321_v43 = vadd.s32 4294967280, %v309_v39  ;;  %s1151_s10 = scalar_lea.vmem [#allocation5], %s684_s25 }
  0x3d   : > { %v274_v17 = vadd.f32 %v1082_v15, %v1080_v14  ;;  %v1092_v20 = vld [vmem:[%s216_s28 + $0x70] sm:$0xff]  ;;  %v1094_v21 = vld [vmem:[%s216_s28 + $0x78] sm:$0xff]  ;;  %v277_v22 = vadd.f32 %v1090_v19, %v1088_v18  ;;  %v291_v24 = vld [vmem:[%s1233_s1] sm:$0xff]  ;;  %v328_v44 = vadd.s32 4294967272, %v309_v39  ;;  %v312_v46 = vsub.s32 %v309_v39, %v1124_v40  ;;  %s696_s25 = sshll.u32 %s959_s22, 11  ;;  %s604_s11 = sshll.u32 %s1151_s10, 4  ;;  %s1184_s11 = int_to_ptr.vmem [resolvable:$true] %s604_s11 }
  0x3e   : > { %v280_v23 = vadd.f32 %v1094_v21, %v1092_v20  ;;  %v292_v25 = vld [vmem:[%s1233_s1 + $0x8] sm:$0xff]  ;;  %v293_v28 = vld [vmem:[%s1233_s1 + $0x10] sm:$0xff]  ;;  %v294_v29 = vld [vmem:[%s1233_s1 + $0x18] sm:$0xff]  ;;  %v317_v48 = vsub.s32 %v314_v41, %v1124_v40  ;;  %v335_v49 = vadd.s32 4294967264, %v309_v39  ;;  %v324_v50 = vsub.s32 %v321_v43, %v1124_v40  ;;  %s1182_s26 = scalar_lea.hbm %s1237_s5, %s696_s25  ;;  %s591_s22 = scalar_lea.sflag [#allocation4], %s1042_s23 }
  0x3f   : > { %263 = vadd.xlane.f32.xlu0 %v262_v10  ;;  %v733_v26 = vpack.c.bf16 %v292_v25, %v291_v24  ;;  %v736_v30 = vpack.c.bf16 %v294_v29, %v293_v28  ;;  %v295_v31 = vld [vmem:[%s1233_s1 + $0x20] sm:$0xff]  ;;  %v296_v32 = vld [vmem:[%s1233_s1 + $0x28] sm:$0xff]  ;;  %v297_v34 = vld [vmem:[%s1233_s1 + $0x30] sm:$0xff]  ;;  %v331_v53 = vsub.s32 %v328_v44, %v1124_v40  ;;  %v342_v54 = vadd.s32 4294967256, %v309_v39  ;;  %s831_s28 = scalar_lea.vmem %s1184_s11, 2048  ;;  %p1244_p11 = scmp.ne.s32.totalorder %s1241_s30, 0 }
  0x40   : > { %269 = vadd.xlane.f32.xlu1 %v268_v11  ;;  %v739_v33 = vpack.c.bf16 %v296_v32, %v295_v31  ;;  %v298_v35 = vld [vmem:[%s1233_s1 + $0x38] sm:$0xff]  ;;  %v338_v60 = vsub.s32 %v335_v49, %v1124_v40  ;;  %v349_v61 = vadd.s32 4294967248, %v309_v39  ;;  %v356_v10 = vadd.s32 4294967240, %v309_v39  ;;  %v437_v39 = vld [vmem:[%s1235_s3] sm:$0xf]  ;;  %p832_p6 = scmp.ne.s32.totalorder %s1184_s11, %s831_s28  ;;  %s905_s29 = smov [#allocation5]  }
  0x41   : > { %734 = vmatpush3.bf16.msra.mxu0 %v733_v26  ;;  %v742_v36 = vpack.c.bf16 %v298_v35, %v297_v34  ;;  %v345_v7 = vsub.s32 %v342_v54, %v1124_v40  ;;  %vm363_vm8 = vcmask 523264   ;;  %vm443_vm9 = vcmask 1043456   ;;  %v299_v41 = vld [vmem:[%s1234_s2] sm:$0x1]  ;;  %s835_s12 = sshll.u32 %s905_s29, 4  ;;  %s836_s12 = int_to_ptr.vmem [resolvable:$false] %s835_s12 }
  0x42   : > { %735 = vmatprep.subr.bf16.mxu0 %v902_v27  ;;  %v352_v26 = vsub.s32 %v349_v61, %v1124_v40  ;;  %v359_v29 = vsub.s32 %v356_v10, %v1124_v40  ;;  %728 = vmatpush3.msk.msra.mxu1 %vm443_vm9, %v437_v39  ;;  %vm439_vm10 = vcmask 31744   ;;  %p833_p12 = pnand %p832_p6, %p1244_p11  ;;  %s837_s14 = scalar_lea.vmem %s836_s12, 4096 }
  0x43   : > { %272 = vadd.xlane.f32.xlu0 %v271_v16  ;;  %p838_p8 = scmp.lt.s32.totalorder %s1184_s11, %s836_s12  ;;  %p839_p10 = scmp.lt.s32.totalorder %s837_s14, %s831_s28 }
  0x44   : > { %275 = vadd.xlane.f32.xlu1 %v274_v17  ;;  %p834_p13 = pneg %p833_p12 }
  0x45   : > { %737 = vmatpush3.bf16.msra.mxu0 %v736_v30  ;;  %p840_p0 = por %p839_p10, %p838_p8 }
  0x46   : > { %738 = vmatprep.subr.bf16.mxu0 %v902_v27 }
  0x47   : > { %278 = vadd.xlane.f32.xlu0 %v277_v22  ;;  %p841_p2 = pnand %p840_p0, %p834_p13 }
  0x48   : > { %281 = vadd.xlane.f32.xlu1 %v280_v23 }
  0x49   : > { %740 = vmatpush3.bf16.msra.mxu0 %v739_v33 }
  0x4a   : > { %741 = vmatprep.subr.bf16.mxu0 %v902_v27 }
  0x4d   : > { %743 = vmatpush3.bf16.msra.mxu0 %v742_v36 }
  0xc8   : > { %v261_v42 = vpop.xlane.xlu0 %260 }
  0xc9   : > { %v267_v45 = vpop.xlane.xlu1 %266  ;;  %v283_v47 = vmul.f32 0.00390625, %v261_v42 }
  0xca   : > { %v285_v51 = vmul.f32 0.00390625, %v267_v45 }
  0xcb   : > { %v313_v58 = vrot.slane %v283_v47, %v312_v46  ;;  %v438_v46 = vld [vmem:[%s1236_s4] sm:$0x1] }
  0xcc   : > { %v264_v52 = vpop.xlane.xlu0 %263  ;;  %v325_v62 = vrot.slane %v285_v51, %v324_v50 }
  0xcd   : > { %v284_v55 = vmul.f32 0.00390625, %v264_v52  ;;  %v270_v56 = vpop.xlane.xlu1 %269 }
  0xce   : > { %v286_v57 = vmul.f32 0.00390625, %v270_v56 }
  0xcf   : > { %v318_v59 = vrot.slane %v284_v55, %v317_v48 }
  0xd0   : > { %v332_v63 = vrot.slane %v286_v57, %v331_v53  ;;  %v273_v3 = vpop.xlane.xlu0 %272  ;;  %v525_v53 = vsub.s32 0, %v1124_v40 }
  0xd1   : > { %v320_v11 = vsel %vm319_vm1, %v318_v59, %v313_v58  ;;  %v287_v16 = vmul.f32 0.00390625, %v273_v3  ;;  %v276_v17 = vpop.xlane.xlu1 %275 }
  0xd2   : > { %v327_v22 = vsel %vm326_vm2, %v325_v62, %v320_v11  ;;  %v288_v23 = vmul.f32 0.00390625, %v276_v17 }
  0xd3   : > { %v334_v24 = vsel %vm333_vm3, %v332_v63, %v327_v22  ;;  %v339_v25 = vrot.slane %v287_v16, %v338_v60 }
  0xd4   : > { %v346_v27 = vrot.slane %v288_v23, %v345_v7  ;;  %v279_v28 = vpop.xlane.xlu0 %278 }
  0xd5   : > { %v341_v30 = vsel %vm340_vm4, %v339_v25, %v334_v24  ;;  %v289_v31 = vmul.f32 0.00390625, %v279_v28  ;;  %v282_v32 = vpop.xlane.xlu1 %281 }
  0xd6   : > { %v290_v33 = vmul.f32 0.00390625, %v282_v32  ;;  %v348_v35 = vsel %vm347_vm5, %v346_v27, %v341_v30 }
  0xd7   : > { %v353_v34 = vrot.slane %v289_v31, %v352_v26 }
  0xd8   : > { %v360_v36 = vrot.slane %v290_v33, %v359_v29 }
  0xd9   : > { %v355_v37 = vsel %vm354_vm6, %v353_v34, %v348_v35 }
  0xda   : > { %v362_v38 = vsel %vm361_vm7, %v360_v36, %v355_v37 }
  0xdb   : > { %725 = vmatmul.mubr.msk.f32.vlgmr.msra.gmra.mrb[0].mxu0 %vm363_vm8, %v362_v38 }
 0x1ae   : > { %v432_v42 = vpop.f32.mrb[0].mxu0 }
 0x1af   : > { %v433_v43 = vadd.f32 %v432_v42, %v299_v41  ;;  %v726_v44 = vpop.f32.mrb[1].mxu0 }
 0x1b1   : > { %v436_v45 = vmax.f32 %v433_v43, 0.0 }
 0x1b3   : > { %730 = vmatmul.mubr.msk.f32.vlgmr.msra.gmra.mrb[0].mxu1 %vm439_vm10, %v436_v45 }
 0x286   : > { %v513_v47 = vpop.f32.mrb[0].mxu1 }
 0x287   : > { %v514_v48 = vadd.f32 %v513_v47, %v438_v46  ;;  %v731_v49 = vpop.f32.mrb[1].mxu1 }
 0x289   : > { %v689_v50 = vmul.f32 -1.442695, %v514_v48 }
 0x28b   : > { %797 = vpow2.f32 %v689_v50 }
 0x295   : > { %v798_v51 = vpop.eup %797 }
 0x296   : > { %v520_v52 = vadd.f32 1.0, %v798_v51 }
 0x298   : > { %799 = vrcp.f32 %v520_v52 }
 0x2a2   : > { %v800_v54 = vpop.eup %799 }
 0x2a3   : > { %v526_v55 = vrot.slane %v800_v54, %v525_v53 }
 0x2a5   : > { %532 = vbcast.lane.b32.xlu1 %v526_v55, 264  ;;  %528 = vbcast.lane.b32.xlu0 %v526_v55, 256 }
 0x2a9   : > { %536 = vbcast.lane.b32.xlu1 %v526_v55, 272  ;;  %544 = vbcast.lane.b32.xlu0 %v526_v55, 288 }
 0x2ad   : > { %540 = vbcast.lane.b32.xlu1 %v526_v55, 280  ;;  %552 = vbcast.lane.b32.xlu0 %v526_v55, 304 }
 0x2b1   : > { %548 = vbcast.lane.b32.xlu1 %v526_v55, 296 }
 0x2b5   : > { %556 = vbcast.lane.b32.xlu1 %v526_v55, 312 }
 0x317   : > { %v533_v56 = vpop.permute.xlu1 %532  ;;  %v529_v57 = vpop.permute.xlu0 %528 }
 0x318   : > { %v560_v58 = vmul.f32 %v533_v56, %v1062_v5  ;;  %v561_v59 = vmul.f32 %v533_v56, %v1064_v6  ;;  %v558_v60 = vmul.f32 %v529_v57, %v1052_v0  ;;  %v559_v40 = vmul.f32 %v529_v57, %v1054_v1 }
 0x31a   : > { %576 = vst [vmem:[%s1151_s10 + $0x10] sm:$0xff] %v560_v58  ;;  %577 = vst [vmem:[%s1151_s10 + $0x18] sm:$0xff] %v561_v59 }
 0x31b   : > { %574 = vst [vmem:[%s1151_s10] sm:$0xff] %v558_v60  ;;  %575 = vst [vmem:[%s1151_s10 + $0x8] sm:$0xff] %v559_v40  ;;  %v537_v5 = vpop.permute.xlu1 %536  ;;  %v545_v0 = vpop.permute.xlu0 %544 }
 0x31c   : > { %v562_v1 = vmul.f32 %v537_v5, %v1056_v2  ;;  %v563_v6 = vmul.f32 %v537_v5, %v1060_v4  ;;  %v566_v61 = vmul.f32 %v545_v0, %v1076_v12  ;;  %v567_v62 = vmul.f32 %v545_v0, %v1078_v13 }
 0x31e   : > { %578 = vst [vmem:[%s1151_s10 + $0x20] sm:$0xff] %v562_v1  ;;  %579 = vst [vmem:[%s1151_s10 + $0x28] sm:$0xff] %v563_v6 }
 0x31f   : > { %582 = vst [vmem:[%s1151_s10 + $0x40] sm:$0xff] %v566_v61  ;;  %583 = vst [vmem:[%s1151_s10 + $0x48] sm:$0xff] %v567_v62  ;;  %v541_v63 = vpop.permute.xlu1 %540  ;;  %v553_v3 = vpop.permute.xlu0 %552 }
 0x320   : > { %v564_v2 = vmul.f32 %v541_v63, %v1068_v8  ;;  %v565_v7 = vmul.f32 %v541_v63, %v1070_v9  ;;  %v570_v4 = vmul.f32 %v553_v3, %v1088_v18  ;;  %v571_v12 = vmul.f32 %v553_v3, %v1090_v19 }
 0x322   : > { %580 = vst [vmem:[%s1151_s10 + $0x30] sm:$0xff] %v564_v2  ;;  %581 = vst [vmem:[%s1151_s10 + $0x38] sm:$0xff] %v565_v7 }
 0x323   : > { %586 = vst [vmem:[%s1151_s10 + $0x60] sm:$0xff] %v570_v4  ;;  %587 = vst [vmem:[%s1151_s10 + $0x68] sm:$0xff] %v571_v12  ;;  %v549_v13 = vpop.permute.xlu1 %548 }
 0x324   : > { %v568_v10 = vmul.f32 %v549_v13, %v1080_v14  ;;  %v569_v11 = vmul.f32 %v549_v13, %v1082_v15 }
 0x326   : > { %584 = vst [vmem:[%s1151_s10 + $0x50] sm:$0xff] %v568_v10  ;;  %585 = vst [vmem:[%s1151_s10 + $0x58] sm:$0xff] %v569_v11 }
 0x327   : > { %v557_v8 = vpop.permute.xlu1 %556 }
 0x328   : > { %v572_v9 = vmul.f32 %v557_v8, %v1092_v20  ;;  %v573_v14 = vmul.f32 %v557_v8, %v1094_v21 }
 0x32a   : > { %588 = vst [vmem:[%s1151_s10 + $0x70] sm:$0xff] %v572_v9  ;;  %589 = vst [vmem:[%s1151_s10 + $0x78] sm:$0xff] %v573_v14 }
 0x32b   : > { %844 = shalt.err (!%p841_p2)
}
 0x32c   : > { %s845_s15 = scalar_lea.hbm %s1182_s26, 2048  ;;  %s849_s7 = scalar_lea.hbm %s1237_s5, 4096 }
 0x32d   : > { %p846_p4 = scmp.ne.s32.totalorder %s1182_s26, %s845_s15  ;;  %p850_p9 = scmp.lt.u32.totalorder %s1182_s26, %s1237_s5 }
 0x32e   : > { %p851_p1 = scmp.lt.u32.totalorder %s849_s7, %s845_s15  ;;  %p853_p6 = scmp.lt.u32.totalorder %s845_s15, %s1182_s26 }
 0x32f   : > { %p847_p5 = pnand %p846_p4, %p1244_p11 }
 0x330   : > { %p852_p3 = por %p851_p1, %p850_p9 }
 0x331   : > { %p848_p7 = pneg %p847_p5 }
 0x332   : > { %p854_p12 = por %p853_p6, %p852_p3 }
 0x334   : > { %p855_p13 = pnand %p854_p12, %p848_p7 }
 0x336   : > { %858 = shalt.err (!%p855_p13)
}
 0x337   : > { %s906_s25 = smov 256   ;;  %s907_s13 = smov 16  }
 0x338   : > { %746 = dma.vmem_to_hbm [thread:$0]  (%p1244_p11), %s1184_s11, 2048, %s1182_s26, %s591_s22, %s906_s25, %s906_s25, %s907_s13  }
 0x339 PF: > { %s619_s17 = sand.u32 1, %s885_s18   ;;  %p1245_p8 = scmp.ne.s32.totalorder %s1242_s6, 0 }
 0x33a   : > { %p1246_p10 = scmp.ge.s32.totalorder %s897_s21, 2  ;;  %s620_s28 = scalar_lea.sflag [#allocation4], %s619_s17 }
 0x33c   : > { %p753_p0 = pnand %p1246_p10, %p1245_p8 }
 0x33e   : > { %880 = dma.done.wait (!%p753_p0), %s620_s28, 2048  }
 0x33f   : > { %882 = vsyncadd (!%p753_p0), %s620_s28, 4294965248  ;;  %p18_p2 = scmp.ge.s32.totalorder %s963_s24, 4   ;;  %s1247_s18 = smov %s889_s19 }
 0x340   : > { %s1248_s19 = smov %s893_s20  ;;  %s1249_s20 = smov %s975_s27 }
 0x341   : > { %s1250_s21 = smov %s963_s24  ;;  %20 = sbr.rel (!%p18_p2) target bundleno = 5 (0x5), region = 85 }
 0x348   :  { %625 = vsyncpa [#allocation3], 1 }
 0x349   :  { %627 = vsyncpa [#allocation3 + $0x1], 1 }
 0x34a   :  { %628 = vsyncpa [#allocation4], 1 }
 0x34b   :  { %630 = vsyncpa [#allocation4 + $0x1], 1 }

</bundles_post_ra>
